<compile_context>
chip_gen: v5e
topology: v5e:2x2
jax: 0.10.0
libtpu: 0.0.40
codegen_flags: <defaults>
</compile_context>

<pallas_src>
import jax
import jax.numpy as jnp
from jax.experimental import pallas as pl
from jax.experimental.pallas import tpu as pltpu

# <= 75% of a v7x TensorCore's physical VMEM (64 MiB); v5e/v6e have 128 MiB.
_VMEM_LIMIT = 48 * 1024 * 1024


# ----------------------------- Pallas kernels ------------------------------ #

def _make_stem_kernel(c):
    """silu(x @ [w0|w1] + [b0|b1]) emitted as two lane-dense outputs (cv0, cv1)."""
    def kernel(x_ref, w_ref, b_ref, o0_ref, o1_ref):
        y = jnp.dot(x_ref[...], w_ref[...], preferred_element_type=jnp.float32)
        y = y + b_ref[...]
        y = y * jax.nn.sigmoid(y)
        o0_ref[...] = y[:, :c].astype(o0_ref.dtype)
        o1_ref[...] = y[:, c:].astype(o1_ref.dtype)
    return kernel


def _make_concat_mm_kernel(num_in):
    """silu(concat_K(x_i) @ w + b): one full-K MXU matmul (fused concat + cv2)."""
    def kernel(*refs):
        xs = refs[:num_in]
        w_ref, b_ref, o_ref = refs[num_in], refs[num_in + 1], refs[num_in + 2]
        if num_in == 1:
            xcat = xs[0][...]
        else:
            xcat = jnp.concatenate([r[...] for r in xs], axis=1)
        y = jnp.dot(xcat, w_ref[...], preferred_element_type=jnp.float32)
        y = y + b_ref[...]
        y = y * jax.nn.sigmoid(y)
        o_ref[...] = y.astype(o_ref.dtype)
    return kernel


def _make_conv3x3_kernel(H, W, C, Cout, residual):
    """3x3 stride-1 pad-1 conv + bias + SiLU (+fused residual) as 3 matmuls.

    Input tile is the flat padded-pixel layout ((H+2)*(W+2), C).  The three
    dx-shifts are concatenated along K once (VMEM-internal, bf16); each dy then
    contributes a single contiguous row-slab matmul with K = 3*C.  Only the two
    pad columns are dropped at the very end (one output-sized extraction).
    """
    Wp = W + 2
    P = (H + 2) * Wp
    HWp = H * Wp

    def kernel(*refs):
        if residual:
            x_ref, w_ref, b_ref, r_ref, o_ref = refs
        else:
            x_ref, w_ref, b_ref, o_ref = refs
        x = x_ref[0]                                         # (P, C) bf16
        # xcat[p] = [x[p], x[p+1], x[p+2]]  (tail zeros only feed pad columns).
        xz = jnp.concatenate([x, jnp.zeros((2, C), x.dtype)], axis=0)   # (P+2, C)
        xcat = jnp.concatenate([xz[0:P], xz[1:P + 1], xz[2:P + 2]], axis=1)  # (P, 3C)
        acc = None
        for dy in range(3):
            slab = xcat[dy * Wp: dy * Wp + HWp]              # contiguous row slab
            t = jnp.dot(slab, w_ref[dy], preferred_element_type=jnp.float32)
            acc = t if acc is None else acc + t              # (H*Wp, Cout) f32
        y = acc + b_ref[...]
        y = y * jax.nn.sigmoid(y)
        y = y.reshape(H, Wp, Cout)[:, :W, :]                 # drop the 2 pad columns
        if residual:
            y = y + r_ref[0].astype(jnp.float32)
        o_ref[0] = y.astype(o_ref.dtype)
    return kernel


# ------------------------------ kernel wrappers ---------------------------- #

def _choose_tm(M, max_tm=1024):
    """Largest tile <= max_tm dividing M, preferring >=4 grid steps (v7x 2 TCs)."""
    divisors = [t for t in (1024, 512, 256, 128, 64, 32, 16, 8)
                if t <= max_tm and M % t == 0]
    for min_steps in (4, 2):
        for t in divisors:
            if M // t >= min_steps:
                return t, False
    if divisors:
        return divisors[0], False
    return min(128, max_tm), True


def fused_stem(x2d, w, bias, c):
    """(cv0, cv1) = split(silu(x @ [w0|w1] + b)); two (M, c) bf16 outputs."""
    M, K = x2d.shape
    N2 = w.shape[1]
    tm, need_pad = _choose_tm(M)
    Mp = M
    if need_pad:
        Mp = pl.cdiv(M, tm) * tm
        x2d = jnp.pad(x2d, ((0, Mp - M), (0, 0)))
    y0, y1 = pl.pallas_call(
        _make_stem_kernel(c),
        out_shape=(jax.ShapeDtypeStruct((Mp, c), jnp.bfloat16),
                   jax.ShapeDtypeStruct((Mp, c), jnp.bfloat16)),
        grid_spec=pltpu.PrefetchScalarGridSpec(
            num_scalar_prefetch=0,
            grid=(Mp // tm,),
            in_specs=[pl.BlockSpec((tm, K), lambda i: (i, 0)),
                      pl.BlockSpec((K, N2), lambda i: (0, 0)),
                      pl.BlockSpec((1, N2), lambda i: (0, 0))],
            out_specs=(pl.BlockSpec((tm, c), lambda i: (i, 0)),
                       pl.BlockSpec((tm, c), lambda i: (i, 0))),
        ),
        compiler_params=pltpu.CompilerParams(
            dimension_semantics=("parallel",),
            vmem_limit_bytes=_VMEM_LIMIT),
    )(x2d, w, bias)
    if need_pad:
        y0, y1 = y0[:M], y1[:M]
    return y0, y1


def fused_concat_matmul_bias_silu(xs, w, bias, out_dtype=jnp.float32):
    """out = silu(concat_K(xs) @ w + bias); xs[i]: (M, K_i) bf16, w: (Ktot, N)."""
    M = xs[0].shape[0]
    Ktot, N = w.shape
    tm, need_pad = _choose_tm(M)
    Mp = M
    if need_pad:
        Mp = pl.cdiv(M, tm) * tm
        xs = [jnp.pad(x, ((0, Mp - M), (0, 0))) for x in xs]
    num_in = len(xs)
    in_specs = ([pl.BlockSpec((tm, x.shape[1]), lambda i: (i, 0)) for x in xs]
                + [pl.BlockSpec((Ktot, N), lambda i: (0, 0)),
                   pl.BlockSpec((1, N), lambda i: (0, 0))])
    out = pl.pallas_call(
        _make_concat_mm_kernel(num_in),
        out_shape=jax.ShapeDtypeStruct((Mp, N), out_dtype),
        grid_spec=pltpu.PrefetchScalarGridSpec(
            num_scalar_prefetch=0,
            grid=(Mp // tm,),
            in_specs=in_specs,
            out_specs=pl.BlockSpec((tm, N), lambda i: (i, 0)),
        ),
        compiler_params=pltpu.CompilerParams(
            dimension_semantics=("parallel",),
            vmem_limit_bytes=_VMEM_LIMIT),
    )(*xs, w, bias)
    return out[:M] if need_pad else out


def conv3x3_bn_silu(p, x_nhwc, residual=None):
    """3x3 stride-1 pad-1 conv (BN folded) + bias + SiLU, optional fused residual."""
    N, H, W, C = x_nhwc.shape
    Cout = p["w"].shape[2]
    Wp = W + 2
    P = (H + 2) * Wp
    # TODO(synk): fold this pad into the producing kernel (padded-interior write).
    xp = jnp.pad(x_nhwc.astype(jnp.bfloat16),
                 ((0, 0), (1, 1), (1, 1), (0, 0))).reshape(N, P, C)
    args = [xp, p["w"], p["bias"]]
    in_specs = [
        pl.BlockSpec((1, P, C), lambda b: (b, 0, 0)),
        pl.BlockSpec((3, 3 * C, Cout), lambda b: (0, 0, 0)),
        pl.BlockSpec((1, Cout), lambda b: (0, 0)),
    ]
    has_res = residual is not None
    if has_res:
        assert C == Cout, "fused residual requires c_in == c_out (C2f bottleneck)"
        args.append(residual.astype(jnp.bfloat16))
        in_specs.append(pl.BlockSpec((1, H, W, C), lambda b: (b, 0, 0, 0)))
    return pl.pallas_call(
        _make_conv3x3_kernel(H, W, C, Cout, has_res),
        out_shape=jax.ShapeDtypeStruct((N, H, W, Cout), jnp.bfloat16),
        grid_spec=pltpu.PrefetchScalarGridSpec(
            num_scalar_prefetch=0,
            grid=(N,),
            in_specs=in_specs,
            out_specs=pl.BlockSpec((1, H, W, Cout), lambda b: (b, 0, 0, 0)),
        ),
        compiler_params=pltpu.CompilerParams(
            dimension_semantics=("parallel",),
            vmem_limit_bytes=_VMEM_LIMIT),
    )(*args)


# ------------------------- parameter construction -------------------------- #

def _fold_bn(gamma, beta, mean, var, eps=1e-3):
    scale = gamma / jnp.sqrt(var + eps)
    bias = beta - mean * scale
    return scale, bias


def init_conv(key, cin, cout, k):
    """Conv2d(cin, cout, k, stride=1, pad=k//2, bias=False) + BN(eps=1e-3) + SiLU."""
    kw, kg, kb, km, kv = jax.random.split(key, 5)
    w_torch = jax.random.normal(kw, (cout, cin, k, k), jnp.float32) * 0.1   # OIHW
    gamma = jax.random.uniform(kg, (cout,), minval=0.5, maxval=1.5)
    beta = jax.random.normal(kb, (cout,), jnp.float32) * 0.1
    mean = jax.random.normal(km, (cout,), jnp.float32) * 0.1
    var = jax.random.uniform(kv, (cout,), minval=0.5, maxval=1.5)
    scale, bias = _fold_bn(gamma, beta, mean, var)
    w_folded = w_torch * scale[:, None, None, None]                          # OIHW f32
    w_kkio = jnp.transpose(w_folded, (2, 3, 1, 0))                           # (k,k,cin,cout)
    if k == 1:
        w_mm = w_kkio.reshape(cin, cout)                                     # (cin, cout)
    else:
        # Wcat[dy][dx*cin + ci, co] = w[dy, dx, ci, co] -> K-concatenated per dy.
        w_mm = w_kkio.reshape(k, k * cin, cout)
    return dict(
        k=k,
        w=w_mm.astype(jnp.bfloat16),                    # Pallas matmul layout
        w_oihw=w_folded.astype(jnp.bfloat16),           # reference (lax.conv) layout
        bias=bias.reshape(1, cout).astype(jnp.float32),
    )


def init_c2f_v2(key, c1, c2, n=1, e=0.5):
    c = int(c2 * e)
    keys = jax.random.split(key, 3 + 2 * n)
    cv0 = init_conv(keys[0], c1, c, 1)
    cv1 = init_conv(keys[1], c1, c, 1)
    cv2 = init_conv(keys[2], (2 + n) * c, c2, 1)
    m = [(init_conv(keys[3 + 2 * i], c, c, 3),
          init_conv(keys[4 + 2 * i], c, c, 3)) for i in range(n)]
    # Fused stem (cv0 | cv1): one matmul against the column-concatenated weight.
    stem_w = jnp.concatenate([cv0["w"], cv1["w"]], axis=1)                   # (c1, 2c)
    stem_b = jnp.concatenate([cv0["bias"], cv1["bias"]], axis=1)             # (1, 2c)
    return dict(c=c, n=n, cv0=cv0, cv1=cv1, cv2=cv2, m=m,
                stem_w=stem_w, stem_b=stem_b)


# ------------------------------ forward pass ------------------------------- #

def c2f_v2_forward(params, x_nchw, shortcut=False):
    N, C1, H, W = x_nchw.shape
    c = params["c"]
    x_nhwc = jnp.transpose(x_nchw, (0, 2, 3, 1))                 # NCHW -> NHWC
    M = N * H * W
    x2d = x_nhwc.reshape(M, C1).astype(jnp.bfloat16)

    # Fused stem: cv0 and cv1 share the input -> one matmul, two lane-dense outputs.
    y0, y1 = fused_stem(x2d, params["stem_w"], params["stem_b"], c)
    branches = [y0, y1]
    cur = y1.reshape(N, H, W, c)                                  # cv1 output, NHWC

    for (b1, b2) in params["m"]:
        mid = conv3x3_bn_silu(b1, cur)
        out = conv3x3_bn_silu(b2, mid, residual=cur if shortcut else None)
        branches.append(out.reshape(M, c))
        cur = out

    # Fused concat + cv2: in-VMEM K-concat + single full-K matmul.
    out2d = fused_concat_matmul_bias_silu(branches, params["cv2"]["w"],
                                          params["cv2"]["bias"],
                                          out_dtype=jnp.float32)
    out = out2d.reshape(N, H, W, -1)
    return jnp.transpose(out, (0, 3, 1, 2))                       # NHWC -> NCHW


# ------------------------- pure-JAX reference (check) ----------------------- #

def _ref_conv(p, x_nchw, residual=None, out_dtype=jnp.bfloat16):
    k = p["k"]
    pad = (k - 1) // 2
    y = jax.lax.conv_general_dilated(
        x_nchw.astype(jnp.bfloat16), p["w_oihw"], (1, 1), [(pad, pad), (pad, pad)],
        dimension_numbers=("NCHW", "OIHW", "NCHW"),
        preferred_element_type=jnp.float32)
    y = y + p["bias"].reshape(1, -1, 1, 1)
    y = y * jax.nn.sigmoid(y)
    if residual is not None:
        y = y + residual.astype(jnp.float32)
    return y.astype(out_dtype)


def _ref_forward(params, x_nchw, shortcut=False):
    y = [_ref_conv(params["cv0"], x_nchw), _ref_conv(params["cv1"], x_nchw)]
    for (b1, b2) in params["m"]:
        inp = y[-1]
        mid = _ref_conv(b1, inp)
        out = _ref_conv(b2, mid, residual=inp if shortcut else None)
        y.append(out)
    return _ref_conv(params["cv2"], jnp.concatenate(y, axis=1),
                     out_dtype=jnp.float32)


# ---------------------------------- main ------------------------------------ #

if __name__ == "__main__":
    key = jax.random.PRNGKey(0)
    kx, kp = jax.random.split(key)

    # Small shapes consistent with the module: batch=2, c1=4, c2=8, 16x16.
    c1, c2, n = 4, 8, 1
    x = jax.random.normal(kx, (2, c1, 16, 16), jnp.float32)
    params = init_c2f_v2(kp, c1, c2, n=n, e=0.5)

    for shortcut in (False, True):
        out = jax.block_until_ready(c2f_v2_forward(params, x, shortcut=shortcut))
        ref = jax.block_until_ready(_ref_forward(params, x, shortcut=shortcut))
        assert out.shape == (2, c2, 16, 16), out.shape
        max_err = float(jnp.max(jnp.abs(out - ref)))
        assert jnp.allclose(out, ref, rtol=2e-3, atol=2e-3), max_err

    print("KERNEL_OK")
</pallas_src>

<mosaic_0001>
module attributes {stable_mosaic.version = 11 : i64} {
  func.func @kernel(%arg0: i32, %arg1: memref<128x4xbf16, #tpu.memory_space<vmem>>, %arg2: memref<4x8xbf16, #tpu.memory_space<vmem>>, %arg3: memref<1x8xf32, #tpu.memory_space<vmem>>, %arg4: memref<128x4xbf16, #tpu.memory_space<vmem>>, %arg5: memref<128x4xbf16, #tpu.memory_space<vmem>>) attributes {dimension_semantics = [#tpu.dimension_semantics<parallel>], iteration_bounds = array<i64: 4>, scalar_prefetch = 0 : i64, scratch_operands = 0 : i64, tpu.core_type = #tpu.core_type<tc>, window_params = [{transform_indices = @transform_0, window_bounds = array<i64: 128, 4>}, {pipeline_mode = #tpu.pipeline_mode<synchronous>, transform_indices = @transform_1, window_bounds = array<i64: 4, 8>}, {pipeline_mode = #tpu.pipeline_mode<synchronous>, transform_indices = @transform_2, window_bounds = array<i64: 1, 8>}, {transform_indices = @transform_3, window_bounds = array<i64: 128, 4>}, {transform_indices = @transform_4, window_bounds = array<i64: 128, 4>}]} {
    %c0 = arith.constant 0 : index
    %c0_0 = arith.constant 0 : index
    %0 = vector.load %arg1[%c0, %c0_0] : memref<128x4xbf16, #tpu.memory_space<vmem>>, vector<128x4xbf16>
    %c0_1 = arith.constant 0 : index
    %c0_2 = arith.constant 0 : index
    %1 = vector.load %arg2[%c0_1, %c0_2] : memref<4x8xbf16, #tpu.memory_space<vmem>>, vector<4x8xbf16>
    %cst = arith.constant dense<0.000000e+00> : vector<128x8xf32>
    %2 = tpu.matmul %0, %1, %cst {dimension_numbers = #tpu.dot_dimension_numbers<[1], [0], [0], [1], [0, 0, 1, 1], [], []>} : vector<128x4xbf16>, vector<4x8xbf16>, vector<128x8xf32> -> vector<128x8xf32>
    %c0_3 = arith.constant 0 : index
    %c0_4 = arith.constant 0 : index
    %3 = vector.load %arg3[%c0_3, %c0_4] : memref<1x8xf32, #tpu.memory_space<vmem>>, vector<1x8xf32>
    %4 = vector.broadcast %3 : vector<1x8xf32> to vector<128x8xf32>
    %5 = arith.addf %2, %4 : vector<128x8xf32>
    %6 = arith.negf %5 : vector<128x8xf32>
    %7 = math.exp %6 : vector<128x8xf32>
    %cst_5 = arith.constant 1.000000e+00 : f32
    %8 = vector.broadcast %cst_5 : f32 to vector<128x8xf32>
    %9 = arith.addf %8, %7 : vector<128x8xf32>
    %10 = arith.divf %8, %9 : vector<128x8xf32>
    %11 = arith.mulf %5, %10 : vector<128x8xf32>
    %12 = vector.extract_strided_slice %11 {offsets = [0, 0], sizes = [128, 4], strides = [1, 1]} : vector<128x8xf32> to vector<128x4xf32>
    %13 = arith.truncf %12 : vector<128x4xf32> to vector<128x4xbf16>
    %c0_6 = arith.constant 0 : index
    %c0_7 = arith.constant 0 : index
    %14 = vector.load %arg4[%c0_6, %c0_7] : memref<128x4xbf16, #tpu.memory_space<vmem>>, vector<128x4xbf16>
    tpu.vector_store %arg4[%c0_6, %c0_7], %13 {strides = array<i32>} : memref<128x4xbf16, #tpu.memory_space<vmem>>, vector<128x4xbf16>,
    %15 = vector.extract_strided_slice %11 {offsets = [0, 4], sizes = [128, 4], strides = [1, 1]} : vector<128x8xf32> to vector<128x4xf32>
    %16 = arith.truncf %15 : vector<128x4xf32> to vector<128x4xbf16>
    %c0_8 = arith.constant 0 : index
    %c0_9 = arith.constant 0 : index
    %17 = vector.load %arg5[%c0_8, %c0_9] : memref<128x4xbf16, #tpu.memory_space<vmem>>, vector<128x4xbf16>
    tpu.vector_store %arg5[%c0_8, %c0_9], %16 {strides = array<i32>} : memref<128x4xbf16, #tpu.memory_space<vmem>>, vector<128x4xbf16>,
    return
  }
  func.func @transform_0(%arg0: i32) -> (i32, i32) {
    %c0_i32 = arith.constant 0 : i32
    %c0_i32_0 = arith.constant 0 : i32
    return %arg0, %c0_i32 : i32, i32
  }
  func.func @transform_1(%arg0: i32) -> (i32, i32) {
    %c0_i32 = arith.constant 0 : i32
    %c0_i32_0 = arith.constant 0 : i32
    %c0_i32_1 = arith.constant 0 : i32
    return %c0_i32, %c0_i32_0 : i32, i32
  }
  func.func @transform_2(%arg0: i32) -> (i32, i32) {
    %c0_i32 = arith.constant 0 : i32
    %c0_i32_0 = arith.constant 0 : i32
    %c0_i32_1 = arith.constant 0 : i32
    return %c0_i32, %c0_i32_0 : i32, i32
  }
  func.func @transform_3(%arg0: i32) -> (i32, i32) {
    %c0_i32 = arith.constant 0 : i32
    %c0_i32_0 = arith.constant 0 : i32
    return %arg0, %c0_i32 : i32, i32
  }
  func.func @transform_4(%arg0: i32) -> (i32, i32) {
    %c0_i32 = arith.constant 0 : i32
    %c0_i32_0 = arith.constant 0 : i32
    return %arg0, %c0_i32 : i32, i32
  }
}

</mosaic_0001>

<bundles_post_ra>
// kernel: tpu_custom_call.1
= control target key start
LH: loop header
LB: loop body
LE: loop exit
PB: predicated region body
PF: predicated region fallthrough
CT: control target
= control target key end

     0   :  { %s1066_s15 = smov 0   ;;  %s1585_s0 = inlined_call_operand.vmem [shape: bf16[512,4], index: 0, kind: input, shape index: {}]   ;;  %s1586_s1 = inlined_call_operand.vmem [shape: bf16[4,8], index: 1, kind: input, shape index: {}]   ;;  %s1587_s2 = inlined_call_operand.vmem [shape: f32[1,8], index: 2, kind: input, shape index: {}]   ;;  %s1588_s3 = inlined_call_operand.vmem [shape: bf16[512,4], index: 3, kind: output, shape index: {0}]   ;;  %s1589_s4 = inlined_call_operand.vmem [shape: bf16[512,4], index: 4, kind: output, shape index: {1}]  }
   0x1 LB: > { %s878_s16 = sadd.s32 4294967295, %s1038_s15   ;;  %p882_p0 = scmp.ge.s32.totalorder %s1038_s15, 1  ;;  %s1038_s15 = sphi %s1066_s15, %s15_s15  }
   0x2   : > { %p166_p1 = scmp.lt.s32.totalorder %s1038_s15, 5 }
   0x4   : > { %p167_p2 = pnand %p882_p0, %p166_p1 }
   0x5   : > { %s883_s19 = sshll.u32 (!%p167_p2), %s878_s16, 4  ;;  %s1040_s29 = smov (!%p167_p2), 124  }
   0x6   : > { %170 = sbr.rel (%p167_p2) target bundleno = 387 (0x183), region = 32  ;;  %p198_p3 = scmp.lt.s32.totalorder (!%p167_p2), %s883_s19, 63 }
   0xb   : > { %v232_v0 = vld [vmem:[%s1586_s1] sm:$0x3]  ;;  %vm302_vm0 = vcmask 1041408   ;;  %s1648_s19 = smov (!%p198_p3, %s883_s19), 63  ;;  %vm277_vm1 = vcmask 31744   ;;  %vm1590_vm11 = vcmask 27648  }
   0xc   : > { %v304_v1 = vsel %vm302_vm0, %v232_v0, 0  ;;  %s1077_s20 = sshll.u32 %s1648_s19, 2  ;;  %v1094_v10 = vld [vmem:[%s1587_s2] ss:$0 sm:$0xff] }
   0xd   : > { %313 = vmatpush.bf16.msra.mxu0 %v304_v1  ;;  %955 = vmatpush.bf16.msra.mxu1 %v304_v1  ;;  %s201_s23 = scalar_lea.vmem %s1585_s0, %s1077_s20  ;;  %s1238_s28 = scalar_lea.vmem %s1588_s3, %s1077_s20 }
   0xe   : > { %956 = vmatpush.bf16.msra.mxu2 %v304_v1  ;;  %957 = vmatpush.bf16.msra.mxu3 %v304_v1  ;;  %v947_v2 = vld [vmem:[%s201_s23] sm:$0xff]  ;;  %v949_v3 = vld [vmem:[%s201_s23 + $0x10] sm:$0xff]  ;;  %v948_v6 = vld [vmem:[%s201_s23 + $0x8] sm:$0xff]  ;;  %s1548_s6 = scalar_lea.vmem %s1589_s4, %s1077_s20 }
   0xf   : > { %v951_v4 = vld [vmem:[%s201_s23 + $0x20] sm:$0xff]  ;;  %v953_v5 = vld [vmem:[%s201_s23 + $0x30] sm:$0xff]  ;;  %v950_v7 = vld [vmem:[%s201_s23 + $0x18] sm:$0xff] }
  0x10   : > { %921 = vmatmul.msk.bf16.vlgmr.msra.gmra.mxu0 %vm277_vm1, %v947_v2  ;;  %923 = vmatmul.msk.bf16.vlgmr.msra.gmra.mxu1 %vm277_vm1, %v949_v3  ;;  %v952_v8 = vld [vmem:[%s201_s23 + $0x28] sm:$0xff]  ;;  %v954_v9 = vld [vmem:[%s201_s23 + $0x38] sm:$0xff] }
  0x11   : > { %925 = vmatmul.msk.bf16.vlgmr.msra.gmra.mxu2 %vm277_vm1, %v951_v4  ;;  %927 = vmatmul.msk.bf16.vlgmr.msra.gmra.mxu3 %vm277_vm1, %v953_v5 }
  0x20   : > { %922 = vmatmul.msk.bf16.gmra.mxu0 %vm277_vm1, %v948_v6  ;;  %924 = vmatmul.msk.bf16.gmra.mxu1 %vm277_vm1, %v950_v7 }
  0x21   : > { %926 = vmatmul.msk.bf16.gmra.mxu2 %vm277_vm1, %v952_v8  ;;  %928 = vmatmul.msk.bf16.gmra.mxu3 %vm277_vm1, %v954_v9 }
  0x8d   : > { %v315_v11 = vpop.f32.mrf.mxu0  ;;  %v325_v12 = vpop.f32.mrf.mxu1 }
  0x8e   : > { %v1097_v13 = vadd.f32 %v1094_v10, %v315_v11  ;;  %v1100_v14 = vadd.f32 %v1094_v10, %v325_v12 }
  0x90   : > { %v929_v15 = vmul.f32 -1.442695, %v1097_v13  ;;  %v933_v16 = vmul.f32 -1.442695, %v1100_v14 }
  0x92   : > { %968 = vpow2.f32 %v929_v15 }
  0x93   : > { %970 = vpow2.f32 %v933_v16 }
  0x94   : > { %v335_v17 = vpop.f32.mrf.mxu2  ;;  %v345_v18 = vpop.f32.mrf.mxu3 }
  0x95   : > { %v1105_v19 = vadd.f32 %v1094_v10, %v335_v17  ;;  %v1108_v20 = vadd.f32 %v1094_v10, %v345_v18  ;;  %v317_v21 = vpop.f32.mrf.mxu0  ;;  %v327_v22 = vpop.f32.mrf.mxu1 }
  0x96   : > { %v1111_v23 = vadd.f32 %v1094_v10, %v317_v21  ;;  %v1114_v24 = vadd.f32 %v1094_v10, %v327_v22 }
  0x97   : > { %v937_v25 = vmul.f32 -1.442695, %v1105_v19  ;;  %v941_v26 = vmul.f32 -1.442695, %v1108_v20 }
  0x98   : > { %v969_v27 = vpop.eup %968  ;;  %v930_v29 = vmul.f32 -1.442695, %v1111_v23  ;;  %v934_v30 = vmul.f32 -1.442695, %v1114_v24 }
  0x99   : > { %v971_v28 = vpop.eup %970  ;;  %972 = vpow2.f32 %v937_v25  ;;  %v1120_v31 = vadd.f32 1.0, %v969_v27 }
  0x9a   : > { %974 = vpow2.f32 %v941_v26  ;;  %v1122_v32 = vadd.f32 1.0, %v971_v28 }
  0x9b   : > { %976 = vpow2.f32 %v930_v29 }
  0x9c   : > { %v337_v33 = vpop.f32.mrf.mxu2  ;;  %v347_v34 = vpop.f32.mrf.mxu3  ;;  %978 = vpow2.f32 %v934_v30 }
  0x9d   : > { %v1125_v35 = vadd.f32 %v1094_v10, %v337_v33  ;;  %v1128_v36 = vadd.f32 %v1094_v10, %v347_v34  ;;  %v320_v37 = vpop.f32.mrf.mxu0  ;;  %980 = vrcp.f32 %v1120_v31  ;;  %v330_v44 = vpop.f32.mrf.mxu1 }
  0x9e   : > { %v1131_v38 = vadd.f32 %v1094_v10, %v320_v37  ;;  %982 = vrcp.f32 %v1122_v32  ;;  %v1145_v48 = vadd.f32 %v1094_v10, %v330_v44 }
  0x9f   : > { %v973_v39 = vpop.eup %972  ;;  %v938_v40 = vmul.f32 -1.442695, %v1125_v35  ;;  %v942_v43 = vmul.f32 -1.442695, %v1128_v36 }
  0xa0   : > { %v975_v41 = vpop.eup %974  ;;  %v1136_v42 = vadd.f32 1.0, %v973_v39  ;;  %v931_v46 = vmul.f32 -1.442695, %v1131_v38  ;;  %v935_v60 = vmul.f32 -1.442695, %v1145_v48 }
  0xa1   : > { %v1139_v45 = vadd.f32 1.0, %v975_v41  ;;  %984 = vpow2.f32 %v938_v40  ;;  %v977_v47 = vpop.eup %976 }
  0xa2   : > { %986 = vrcp.f32 %v1136_v42  ;;  %v979_v49 = vpop.eup %978  ;;  %v1147_v50 = vadd.f32 1.0, %v977_v47  ;;  %v548_v52 = vand.u32 2147483647, %v1136_v42  ;;  %v550_v53 = vand.u32 2147483648, %v1136_v42 }
  0xa3   : > { %988 = vrcp.f32 %v1139_v45  ;;  %v1149_v51 = vpop.eup %980  ;;  %v1153_v54 = vadd.f32 1.0, %v979_v49  ;;  %v608_v56 = vand.u32 2147483647, %v1139_v45  ;;  %v610_v57 = vand.u32 2147483648, %v1139_v45 }
  0xa4   : > { %990 = vpow2.f32 %v942_v43  ;;  %v1155_v55 = vpop.eup %982  ;;  %v445_v59 = vand.u32 2147483648, %v1147_v50  ;;  %vm544_vm2 = vweird.f32 %v1136_v42  ;;  %vm604_vm3 = vweird.f32 %v1139_v45  ;;  %v340_v22 = vpop.f32.mrf.mxu2 }
  0xa5   : > { %992 = vpow2.f32 %v931_v46  ;;  %v505_v62 = vand.u32 2147483648, %v1153_v54  ;;  %vm1169_vm4 = vcmp.eq.f32.partialorder %v548_v52, 8.507059e+37  ;;  %v551_v3 = vor.u32 1.1754944e-38, %v550_v53  ;;  %v350_v30 = vpop.f32.mrf.mxu3 }
  0xa6   : > { %994 = vrcp.f32 %v1147_v50  ;;  %v443_v4 = vand.u32 2147483647, %v1147_v50  ;;  %vm1175_vm5 = vcmp.eq.f32.partialorder %v608_v56, 8.507059e+37  ;;  %v611_v8 = vor.u32 1.1754944e-38, %v610_v57 }
  0xa7   : > { %v985_v58 = vpop.eup %984  ;;  %996 = vrcp.f32 %v1153_v54  ;;  %v503_v9 = vand.u32 2147483647, %v1153_v54  ;;  %vm439_vm6 = vweird.f32 %v1147_v50  ;;  %v446_v15 = vor.u32 1.1754944e-38, %v445_v59 }
  0xa8   : > { %v987_v61 = vpop.eup %986  ;;  %v1166_v63 = vadd.f32 1.0, %v985_v58  ;;  %vm499_vm7 = vweird.f32 %v1153_v54  ;;  %v506_v21 = vor.u32 1.1754944e-38, %v505_v62  ;;  %vm1186_vm10 = vcmp.eq.f32.partialorder %v443_v4, 8.507059e+37 }
  0xa9   : > { %v989_v0 = vpop.eup %988  ;;  %v540_v1 = vmul.f32 %v987_v61, %v1136_v42  ;;  %vm545_vm8 = vweird.f32 %v987_v61  ;;  %vm1192_vm12 = vcmp.eq.f32.partialorder %v503_v9, 8.507059e+37  ;;  %v1202_v44 = vadd.f32 %v1094_v10, %v340_v22 }
  0xaa   : > { %v991_v5 = vpop.eup %990  ;;  %v600_v6 = vmul.f32 %v989_v0, %v1139_v45  ;;  %998 = vrcp.f32 %v1166_v63  ;;  %vm605_vm9 = vweird.f32 %v989_v0  ;;  %v563_v29 = vand.u32 2147483647, %v1166_v63  ;;  %vm546_vm14 = vmor %vm544_vm2, %vm545_vm8 }
  0xab   : > { %v993_v11 = vpop.eup %992  ;;  %v541_v12 = vsub.f32 1.0, %v540_v1  ;;  %v1183_v16 = vadd.f32 1.0, %v991_v5  ;;  %1000 = vpow2.f32 %v935_v60  ;;  %v565_v39 = vand.u32 2147483648, %v1166_v63  ;;  %vm606_vm0 = vmor %vm604_vm3, %vm605_vm9 }
  0xac   : > { %v995_v17 = vpop.eup %994  ;;  %v601_v18 = vsub.f32 1.0, %v600_v6  ;;  %v1197_v40 = vadd.f32 1.0, %v993_v11  ;;  %vm559_vm13 = vweird.f32 %v1166_v63  ;;  %v1208_v52 = vadd.f32 %v1094_v10, %v350_v30  ;;  %v342_v30 = vpop.f32.mrf.mxu2 }
  0xad   : > { %v997_v25 = vpop.eup %996  ;;  %v542_v26 = vmul.f32 %v987_v61, %v541_v12  ;;  %v435_v27 = vmul.f32 %v995_v17, %v1147_v50  ;;  %1002 = vrcp.f32 %v1183_v16  ;;  %vm440_vm15 = vweird.f32 %v995_v17 }
  0xae   : > { %v602_v33 = vmul.f32 %v989_v0, %v601_v18  ;;  %v495_v34 = vmul.f32 %v997_v25, %v1153_v54  ;;  %vm1214_vm1 = vcmp.eq.f32.partialorder %v563_v29, 8.507059e+37  ;;  %vm500_vm2 = vweird.f32 %v997_v25  ;;  %vm441_vm3 = vmor %vm439_vm6, %vm440_vm15 }
  0xaf   : > { %v543_v41 = vadd.f32 %v987_v61, %v542_v26  ;;  %v436_v43 = vsub.f32 1.0, %v435_v27  ;;  %v625_v18 = vand.u32 2147483648, %v1183_v16  ;;  %vm619_vm6 = vweird.f32 %v1183_v16  ;;  %v322_v26 = vpop.f32.mrf.mxu0  ;;  %v332_v27 = vpop.f32.mrf.mxu1 }
  0xb0   : > { %v999_v46 = vpop.eup %998  ;;  %v603_v47 = vadd.f32 %v989_v0, %v602_v33  ;;  %v496_v49 = vsub.f32 1.0, %v495_v34  ;;  %v939_v29 = vmul.f32 -1.442695, %v1202_v44  ;;  %v352_v33 = vpop.f32.mrf.mxu3 }
  0xb1   : > { %v547_v53 = vsel %vm546_vm14, %v987_v61, %v543_v41  ;;  %v437_v56 = vmul.f32 %v995_v17, %v436_v43  ;;  %v555_v57 = vmul.f32 %v999_v46, %v1166_v63  ;;  %v1001_v42 = vpop.eup %1000  ;;  %vm560_vm8 = vweird.f32 %v999_v46 }
  0xb2   : > { %v552_v59 = vsel %vm1169_vm4, %v551_v3, %v547_v53  ;;  %v607_v60 = vsel %vm606_vm0, %v989_v0, %v603_v47  ;;  %v497_v62 = vmul.f32 %v997_v25, %v496_v49  ;;  %v623_v0 = vand.u32 2147483647, %v1183_v16  ;;  %vm501_vm4 = vmor %vm499_vm7, %vm500_vm2 }
  0xb3   : > { %v667_v61 = vmul.f32 %v552_v59, %v1105_v19  ;;  %v612_v45 = vsel %vm1175_vm5, %v611_v8, %v607_v60  ;;  %v438_v1 = vadd.f32 %v995_v17, %v437_v56  ;;  %v556_v4 = vsub.f32 1.0, %v555_v57  ;;  %v1003_v2 = vpop.eup %1002  ;;  %vm561_vm5 = vmor %vm559_vm13, %vm560_vm8 }
  0xb4   : > { %v671_v5 = vmul.f32 %v612_v45, %v1108_v20  ;;  %v498_v6 = vadd.f32 %v997_v25, %v497_v62  ;;  %v1232_v7 = vadd.f32 1.0, %v1001_v42  ;;  %v615_v11 = vmul.f32 %v1003_v2, %v1183_v16 }
  0xb5   : > { %v1228_v3 = vpack.c.bf16 %v667_v61, %v667_v61  ;;  %v442_v9 = vsel %vm441_vm3, %v995_v17, %v438_v1  ;;  %v557_v19 = vmul.f32 %v999_v46, %v556_v4  ;;  %vm620_vm7 = vweird.f32 %v1003_v2 }
  0xb6   : > { %v1240_v20 = vpack.c.bf16 %v671_v5, %v671_v5  ;;  %v447_v50 = vsel %vm1186_vm10, %v446_v15, %v442_v9  ;;  %v502_v8 = vsel %vm501_vm4, %v997_v25, %v498_v6  ;;  %v566_v15 = vor.u32 1.1754944e-38, %v565_v39  ;;  %vm621_vm10 = vmor %vm619_vm6, %vm620_vm7 }
  0xb7   : > { %700 = vst.msk [vmem:[%s1238_s28 + $0x20] sm:$0xf] %vm1590_vm11, %v1228_v3  ;;  %v660_v54 = vmul.f32 %v447_v50, %v1111_v23  ;;  %v507_v12 = vsel %vm1192_vm12, %v506_v21, %v502_v8  ;;  %v558_v17 = vadd.f32 %v999_v46, %v557_v19  ;;  %v616_v25 = vsub.f32 1.0, %v615_v11 }
  0xb8   : > { %704 = vst.msk [vmem:[%s1238_s28 + $0x30] sm:$0xf] %vm1590_vm11, %v1240_v20  ;;  %v664_v22 = vmul.f32 %v507_v12, %v1114_v24  ;;  %1004 = vrcp.f32 %v1232_v7  ;;  %vm1272_vm9 = vcmp.eq.f32.partialorder %v623_v0, 8.507059e+37  ;;  %v626_v39 = vor.u32 1.1754944e-38, %v625_v18 }
  0xb9   : > { %v1260_v23 = vpack.c.bf16 %v660_v54, %v660_v54  ;;  %v562_v21 = vsel %vm561_vm5, %v999_v46, %v558_v17  ;;  %v617_v63 = vmul.f32 %v1003_v2, %v616_v25  ;;  %v943_v41 = vmul.f32 -1.442695, %v1208_v52 }
  0xba   : > { %v1263_v28 = vpack.c.bf16 %v664_v22, %v664_v22  ;;  %v567_v24 = vsel %vm1214_vm1, %v566_v15, %v562_v21  ;;  %1006 = vpow2.f32 %v939_v29  ;;  %v1281_v46 = vadd.f32 %v1094_v10, %v322_v26 }
  0xbb   : > { %693 = vst.msk [vmem:[%s1238_s28 + $0x4] sm:$0xf] %vm1590_vm11, %v1260_v23  ;;  %v668_v34 = vmul.f32 %v567_v24, %v1125_v35  ;;  %v618_v43 = vadd.f32 %v1003_v2, %v617_v63  ;;  %v1284_v47 = vadd.f32 %v1094_v10, %v332_v27  ;;  %1008 = vpow2.f32 %v943_v41 }
  0xbc   : > { %697 = vst.msk [vmem:[%s1238_s28 + $0x14] sm:$0xf] %vm1590_vm11, %v1263_v28  ;;  %v1292_v49 = vadd.f32 %v1094_v10, %v342_v30  ;;  %v1295_v53 = vadd.f32 %v1094_v10, %v352_v33  ;;  %v932_v58 = vmul.f32 -1.442695, %v1281_v46  ;;  %v480_v59 = vmul.f32 %v1155_v55, %v1122_v32 }
  0xbd   : > { %v1286_v35 = vpack.c.bf16 %v668_v34, %v668_v34  ;;  %v622_v57 = vsel %vm621_vm10, %v1003_v2, %v618_v43  ;;  %v936_v42 = vmul.f32 -1.442695, %v1284_v47  ;;  %vm514_vm12 = vweird.f32 %v1232_v7 }
  0xbe   : > { %v1005_v56 = vpop.eup %1004  ;;  %v627_v16 = vsel %vm1272_vm9, %v626_v39, %v622_v57  ;;  %v940_v10 = vmul.f32 -1.442695, %v1292_v49  ;;  %v520_v61 = vand.u32 2147483648, %v1232_v7  ;;  %1010 = vpow2.f32 %v932_v58 }
  0xbf   : > { %701 = vst.msk [vmem:[%s1238_s28 + $0x24] sm:$0xf] %vm1590_vm11, %v1286_v35  ;;  %v510_v60 = vmul.f32 %v1005_v56, %v1232_v7  ;;  %v672_v62 = vmul.f32 %v627_v16, %v1128_v36  ;;  %v944_v45 = vmul.f32 -1.442695, %v1295_v53  ;;  %vm515_vm13 = vweird.f32 %v1005_v56 }
  0xc0   : > { %v518_v4 = vand.u32 2147483647, %v1232_v7  ;;  %1012 = vpow2.f32 %v936_v42  ;;  %v1007_v5 = vpop.eup %1006  ;;  %v481_v0 = vsub.f32 1.0, %v480_v59  ;;  %vm1323_vm14 = vmor %vm514_vm12, %vm515_vm13  ;;  %v521_v50 = vor.u32 1.1754944e-38, %v520_v61 }
  0xc1   : > { %v511_v1 = vsub.f32 1.0, %v510_v60  ;;  %v1313_v6 = vpack.c.bf16 %v672_v62, %v672_v62  ;;  %1014 = vpow2.f32 %v940_v10  ;;  %v1009_v2 = vpop.eup %1008  ;;  %v1316_v9 = vadd.f32 1.0, %v1007_v5 }
  0xc2   : > { %1016 = vrcp.f32 %v1197_v40  ;;  %v1327_v8 = vadd.f32 1.0, %v1009_v2  ;;  %vm519_vm15 = vcmp.eq.f32.partialorder %v518_v4, 8.507059e+37  ;;  %v482_v12 = vmul.f32 %v1155_v55, %v481_v0 }
  0xc3   : > { %v512_v36 = vmul.f32 %v1005_v56, %v511_v1  ;;  %705 = vst.msk [vmem:[%s1238_s28 + $0x34] sm:$0xf] %vm1590_vm11, %v1313_v6  ;;  %1018 = vpow2.f32 %v944_v45  ;;  %vm484_vm0 = vweird.f32 %v1122_v32  ;;  %vm485_vm1 = vweird.f32 %v1155_v55 }
  0xc4   : > { %1020 = vrcp.f32 %v1316_v9  ;;  %v1011_v54 = vpop.eup %1010  ;;  %v580_v18 = vand.u32 2147483648, %v1316_v9  ;;  %v488_v15 = vand.u32 2147483647, %v1122_v32  ;;  %v578_v26 = vand.u32 2147483647, %v1316_v9  ;;  %vm1392_vm10 = vmor %vm484_vm0, %vm485_vm1 }
  0xc5   : > { %v513_v11 = vadd.f32 %v1005_v56, %v512_v36  ;;  %1022 = vrcp.f32 %v1327_v8  ;;  %v1337_v22 = vadd.f32 1.0, %v1011_v54  ;;  %v490_v24 = vand.u32 2147483648, %v1122_v32 }
  0xc6   : > { %v1013_v7 = vpop.eup %1012  ;;  %v638_v30 = vand.u32 2147483647, %v1327_v8  ;;  %v640_v33 = vand.u32 2147483648, %v1327_v8  ;;  %vm574_vm2 = vweird.f32 %v1316_v9  ;;  %v1353_v37 = vadd.f32 %v1155_v55, %v482_v12 }
  0xc7   : > { %v517_v17 = vsel %vm1323_vm14, %v1005_v56, %v513_v11  ;;  %v1015_v25 = vpop.eup %1014  ;;  %v1341_v27 = vadd.f32 1.0, %v1013_v7  ;;  %1024 = vrcp.f32 %v1337_v22  ;;  %v1357_v39 = vmul.f32 %v1149_v51, %v1120_v31 }
  0xc8   : > { %v522_v21 = vsel %vm519_vm15, %v521_v50, %v517_v17  ;;  %v1344_v63 = vpop.eup %1016  ;;  %v581_v43 = vor.u32 1.1754944e-38, %v580_v18  ;;  %vm634_vm3 = vweird.f32 %v1327_v8  ;;  %v1362_v56 = vadd.f32 1.0, %v1015_v25 }
  0xc9   : > { %v665_v29 = vmul.f32 %v522_v21, %v1145_v48  ;;  %v1019_v34 = vpop.eup %1018  ;;  %1026 = vrcp.f32 %v1341_v27  ;;  %vm1365_vm8 = vcmp.eq.f32.partialorder %v578_v26, 8.507059e+37  ;;  %v473_v59 = vand.u32 2147483647, %v1337_v22 }
  0xca   : > { %v1021_v48 = vpop.eup %1020  ;;  %v475_v16 = vand.u32 2147483648, %v1337_v22  ;;  %v535_v60 = vand.u32 2147483648, %v1341_v27  ;;  %vm1376_vm4 = vcmp.eq.f32.partialorder %v638_v30, 8.507059e+37  ;;  %v641_v61 = vor.u32 1.1754944e-38, %v640_v33 }
  0xcb   : > { %v1359_v41 = vpack.c.bf16 %v665_v29, %v665_v29  ;;  %v1023_v57 = vpop.eup %1022  ;;  %v570_v58 = vmul.f32 %v1021_v48, %v1316_v9  ;;  %v533_v45 = vand.u32 2147483647, %v1341_v27  ;;  %vm1381_vm5 = vcmp.eq.f32.partialorder %v488_v15, 8.507059e+37 }
  0xcc   : > { %v630_v10 = vmul.f32 %v1023_v57, %v1327_v8  ;;  %vm575_vm6 = vweird.f32 %v1021_v48  ;;  %vm469_vm7 = vweird.f32 %v1337_v22  ;;  %vm529_vm9 = vweird.f32 %v1341_v27 }
  0xcd   : > { %698 = vst.msk [vmem:[%s1238_s28 + $0x18] sm:$0xf] %vm1590_vm11, %v1359_v41  ;;  %v571_v4 = vsub.f32 1.0, %v570_v58  ;;  %1028 = vrcp.f32 %v1362_v56  ;;  %v1025_v0 = vpop.eup %1024  ;;  %vm635_vm12 = vweird.f32 %v1023_v57  ;;  %v595_v36 = vand.u32 2147483648, %v1362_v56  ;;  %vm576_vm1 = vmor %vm574_vm2, %vm575_vm6 }
  0xce   : > { %v631_v2 = vsub.f32 1.0, %v630_v10  ;;  %v1397_v19 = vadd.f32 1.0, %v1019_v34  ;;  %v465_v54 = vmul.f32 %v1025_v0, %v1337_v22  ;;  %vm1400_vm13 = vcmp.eq.f32.partialorder %v473_v59, 8.507059e+37  ;;  %vm1417_vm15 = vmor %vm634_vm3, %vm635_vm12 }
  0xcf   : > { %v1027_v50 = vpop.eup %1026  ;;  %v572_v11 = vmul.f32 %v1021_v48, %v571_v4  ;;  %v476_v7 = vor.u32 1.1754944e-38, %v475_v16  ;;  %v536_v17 = vor.u32 1.1754944e-38, %v535_v60  ;;  %vm1405_vm14 = vcmp.eq.f32.partialorder %v533_v45, 8.507059e+37 }
  0xd0   : > { %v632_v18 = vmul.f32 %v1023_v57, %v631_v2  ;;  %v525_v15 = vmul.f32 %v1027_v50, %v1341_v27  ;;  %v593_v21 = vand.u32 2147483647, %v1362_v56  ;;  %v487_v26 = vsel %vm1392_vm10, %v1155_v55, %v1353_v37 }
  0xd1   : > { %v573_v29 = vadd.f32 %v1021_v48, %v572_v11  ;;  %v466_v33 = vsub.f32 1.0, %v465_v54  ;;  %vm470_vm0 = vweird.f32 %v1025_v0  ;;  %1030 = vrcp.f32 %v1397_v19 }
  0xd2   : > { %v633_v34 = vadd.f32 %v1023_v57, %v632_v18  ;;  %v526_v58 = vsub.f32 1.0, %v525_v15  ;;  %vm530_vm11 = vweird.f32 %v1027_v50  ;;  %vm589_vm10 = vweird.f32 %v1362_v56 }
  0xd3   : > { %v596_v55 = vor.u32 1.1754944e-38, %v595_v36  ;;  %v1029_v37 = vpop.eup %1028  ;;  %v577_v8 = vsel %vm576_vm1, %v1021_v48, %v573_v29  ;;  %v467_v59 = vmul.f32 %v1025_v0, %v466_v33  ;;  %v653_v16 = vand.u32 2147483647, %v1397_v19 }
  0xd4   : > { %v491_v60 = vor.u32 1.1754944e-38, %v490_v24  ;;  %v582_v10 = vsel %vm1365_vm8, %v581_v43, %v577_v8  ;;  %v637_v9 = vsel %vm1417_vm15, %v1023_v57, %v633_v34  ;;  %v527_v45 = vmul.f32 %v1027_v50, %v526_v58  ;;  %vm471_vm8 = vmor %vm469_vm7, %vm470_vm0 }
  0xd5   : > { %v585_v4 = vmul.f32 %v1029_v37, %v1362_v56  ;;  %vm1434_vm2 = vcmp.eq.f32.partialorder %v593_v21, 8.507059e+37  ;;  %v669_v48 = vmul.f32 %v582_v10, %v1202_v44  ;;  %v642_v2 = vsel %vm1376_vm4, %v641_v61, %v637_v9  ;;  %vm531_vm4 = vmor %vm529_vm9, %vm530_vm11 }
  0xd6   : > { %v468_v32 = vadd.f32 %v1025_v0, %v467_v59  ;;  %vm649_vm3 = vweird.f32 %v1397_v19  ;;  %v655_v24 = vand.u32 2147483648, %v1397_v19  ;;  %v673_v43 = vmul.f32 %v642_v2, %v1208_v52 }
  0xd7   : > { %v528_v57 = vadd.f32 %v1027_v50, %v527_v45  ;;  %v586_v42 = vsub.f32 1.0, %v585_v4  ;;  %v421_v36 = vsub.f32 1.0, %v1357_v39  ;;  %v1031_v44 = vpop.eup %1030  ;;  %v1448_v62 = vpack.c.bf16 %v669_v48, %v669_v48 }
  0xd8   : > { %v472_v61 = vsel %vm471_vm8, %v1025_v0, %v468_v32  ;;  %vm590_vm6 = vweird.f32 %v1029_v37  ;;  %v492_v52 = vsel %vm1381_vm5, %v491_v60, %v487_v26  ;;  %v1455_v11 = vpack.c.bf16 %v673_v43, %v673_v43 }
  0xd9   : > { %v477_v22 = vsel %vm1400_vm13, %v476_v7, %v472_v61  ;;  %v532_v54 = vsel %vm531_vm4, %v1027_v50, %v528_v57  ;;  %v587_v39 = vmul.f32 %v1029_v37, %v586_v42  ;;  %vm1621_vm7 = vcmask 27648   ;;  %vm591_vm9 = vmor %vm589_vm10, %vm590_vm6 }
  0xda   : > { %702 = vst.msk [vmem:[%s1238_s28 + $0x28] sm:$0xf] %vm1621_vm7, %v1448_v62  ;;  %v662_v0 = vmul.f32 %v477_v22, %v1281_v46  ;;  %v537_v27 = vsel %vm1405_vm14, %v536_v17, %v532_v54  ;;  %v645_v18 = vmul.f32 %v1031_v44, %v1397_v19  ;;  %vm650_vm11 = vweird.f32 %v1031_v44  ;;  %vm1622_vm5 = vmmov %vm1621_vm7 }
  0xdb   : > { %706 = vst.msk [vmem:[%s1238_s28 + $0x38] sm:$0xf] %vm1622_vm5, %v1455_v11  ;;  %v666_v1 = vmul.f32 %v537_v27, %v1284_v47  ;;  %v588_v12 = vadd.f32 %v1029_v37, %v587_v39  ;;  %v663_v50 = vmul.f32 %v492_v52, %v1100_v14  ;;  %v422_v7 = vmul.f32 %v1149_v51, %v421_v36  ;;  %vm1623_vm14 = vmmov %vm1622_vm5 }
  0xdc   : > { %v678_v15 = vpack.c.bf16 %v662_v0, %v662_v0  ;;  %v646_v46 = vsub.f32 1.0, %v645_v18  ;;  %vm424_vm12 = vweird.f32 %v1120_v31  ;;  %vm425_vm13 = vweird.f32 %v1149_v51  ;;  %vm1626_vm0 = vmmov %vm1622_vm5 }
  0xdd   : > { %v682_v17 = vpack.c.bf16 %v666_v1, %v666_v1  ;;  %v592_v25 = vsel %vm591_vm9, %v1029_v37, %v588_v12  ;;  %v679_v21 = vpack.c.bf16 %v663_v50, %v663_v50  ;;  %v423_v47 = vadd.f32 %v1149_v51, %v422_v7  ;;  %vm1482_vm15 = vmor %vm424_vm12, %vm425_vm13 }
  0xde   : > { %695 = vst.msk [vmem:[%s1238_s28 + $0xc] sm:$0xf] %vm1623_vm14, %v678_v15  ;;  %v597_v14 = vsel %vm1434_vm2, %v596_v55, %v592_v25  ;;  %v647_v26 = vmul.f32 %v1031_v44, %v646_v46  ;;  %v428_v29 = vand.u32 2147483647, %v1120_v31  ;;  %v430_v30 = vand.u32 2147483648, %v1120_v31  ;;  %vm1627_vm10 = vmmov %vm1626_vm0 }
  0xdf   : > { %699 = vst.msk [vmem:[%s1238_s28 + $0x1c] sm:$0xf] %vm1626_vm0, %v682_v17  ;;  %v670_v33 = vmul.f32 %v597_v14, %v1292_v49  ;;  %732 = vrot.lane.b32.xlu2 %v679_v21, %s1040_s29  ;;  %v427_v34 = vsel %vm1482_vm15, %v1149_v51, %v423_v47  ;;  %v450_v58 = vmul.f32 %v1344_v63, %v1197_v40  ;;  %vm654_vm1 = vcmp.eq.f32.partialorder %v653_v16, 8.507059e+37  ;;  %vm651_vm2 = vmor %vm649_vm3, %vm650_vm11 }
  0xe0   : > { %v648_v55 = vadd.f32 %v1031_v44, %v647_v26  ;;  %696 = vst.msk [vmem:[%s1238_s28 + $0x10] sm:$0xf] %vm1627_vm10, %v679_v21  ;;  %v431_v31 = vor.u32 1.1754944e-38, %v430_v30  ;;  %v656_v49 = vor.u32 1.1754944e-38, %v655_v24  ;;  %vm429_vm8 = vcmp.eq.f32.partialorder %v428_v29, 8.507059e+37  ;;  %vm1628_vm6 = vmmov %vm1626_vm0 }
  0xe1   : > { %v686_v37 = vpack.c.bf16 %v670_v33, %v670_v33  ;;  %v451_v8 = vsub.f32 1.0, %v450_v58  ;;  %vm455_vm4 = vweird.f32 %v1344_v63  ;;  %v460_v51 = vand.u32 2147483648, %v1197_v40  ;;  %vm1629_vm11 = vmmov %vm1626_vm0 }
  0xe2   : > { %v652_v59 = vsel %vm651_vm2, %v1031_v44, %v648_v55  ;;  %v432_v60 = vsel %vm429_vm8, %v431_v31, %v427_v34  ;;  %v458_v19 = vand.u32 2147483647, %v1197_v40  ;;  %vm454_vm3 = vweird.f32 %v1197_v40  ;;  %vm1630_vm9 = vmmov %vm1626_vm0 }
  0xe3   : > { %703 = vst.msk [vmem:[%s1238_s28 + $0x2c] sm:$0xf] %vm1628_vm6, %v686_v37  ;;  %v657_v16 = vsel %vm654_vm1, %v656_v49, %v652_v59  ;;  %v659_v10 = vmul.f32 %v432_v60, %v1097_v13  ;;  %v452_v9 = vmul.f32 %v1344_v63, %v451_v8  ;;  %vm456_vm7 = vmor %vm454_vm3, %vm455_vm4  ;;  %v461_v2 = vor.u32 1.1754944e-38, %v460_v51 }
  0xe4   : > { %v674_v45 = vmul.f32 %v657_v16, %v1295_v53  ;;  %vm459_vm5 = vcmp.eq.f32.partialorder %v458_v19, 8.507059e+37  ;;  %vm1631_vm12 = vmmov %vm1626_vm0 }
  0xe5   : > { %v675_v4 = vpack.c.bf16 %v659_v10, %v659_v10  ;;  %v453_v5 = vadd.f32 %v1344_v63, %v452_v9  ;;  %vm1632_vm13 = vmmov %vm1626_vm0 }
  0xe6   : > { %v690_v48 = vpack.c.bf16 %v674_v45, %v674_v45  ;;  %vm1633_vm14 = vmmov %vm1626_vm0 }
  0xe7   : > { %724 = vrot.lane.b32.xlu0 %v675_v4, %s1040_s29  ;;  %692 = vst.msk [vmem:[%s1238_s28] sm:$0xf] %vm1629_vm11, %v675_v4  ;;  %740 = vrot.lane.b32.xlu2 %v1228_v3, %s1040_s29  ;;  %v457_v13 = vsel %vm456_vm7, %v1344_v63, %v453_v5  ;;  %vm1634_vm15 = vmmov %vm1626_vm0 }
  0xe8   : > { %707 = vst.msk [vmem:[%s1238_s28 + $0x3c] sm:$0xf] %vm1630_vm9, %v690_v48  ;;  %v462_v53 = vsel %vm459_vm5, %v461_v2, %v457_v13  ;;  %vm1635_vm1 = vmmov %vm1626_vm0 }
  0xe9   : > { %v661_v32 = vmul.f32 %v462_v53, %v1131_v38  ;;  %vm1636_vm10 = vmmov %vm1626_vm0 }
  0xea   : > { %vm1637_vm2 = vmmov %vm1626_vm0 }
  0xeb   : > { %v677_v40 = vpack.c.bf16 %v661_v32, %v661_v32  ;;  %vm1638_vm8 = vmmov %vm1626_vm0 }
  0xec   : > { %vm1639_vm4 = vmmov %vm1626_vm0 }
  0xed   : > { %728 = vrot.lane.b32.xlu1 %v677_v40, %s1040_s29  ;;  %694 = vst.msk [vmem:[%s1238_s28 + $0x8] sm:$0xf] %vm1631_vm12, %v677_v40  ;;  %vm1640_vm6 = vmmov %vm1626_vm0 }
  0xee   : > { %vm1641_vm3 = vmmov %vm1626_vm0 }
  0xef   : > { %748 = vrot.lane.b32.xlu0 %v1240_v20, %s1040_s29  ;;  %734 = vrot.lane.b32.xlu2 %v1263_v28, %s1040_s29  ;;  %vm1642_vm7 = vmmov %vm1626_vm0 }
  0xf0   : > { %vm1643_vm11 = vmmov %vm1626_vm0 }
  0xf1   : > { %vm1644_vm5 = vmmov %vm1626_vm0 }
  0xf2   : > { %vm1645_vm9 = vmmov %vm1626_vm0 }
  0xf3   : > { %vm1646_vm12 = vmmov %vm1626_vm0 }
  0xf5   : > { %744 = vrot.lane.b32.xlu1 %v1448_v62, %s1040_s29 }
  0xf7   : > { %726 = vrot.lane.b32.xlu0 %v1260_v23, %s1040_s29  ;;  %746 = vrot.lane.b32.xlu2 %v686_v37, %s1040_s29 }
  0xfd   : > { %730 = vrot.lane.b32.xlu1 %v678_v15, %s1040_s29 }
  0xff   : > { %742 = vrot.lane.b32.xlu0 %v1286_v35, %s1040_s29  ;;  %752 = vrot.lane.b32.xlu2 %v1455_v11, %s1040_s29 }
 0x105   : > { %738 = vrot.lane.b32.xlu1 %v682_v17, %s1040_s29 }
 0x107   : > { %736 = vrot.lane.b32.xlu0 %v1359_v41, %s1040_s29 }
 0x10d   : > { %750 = vrot.lane.b32.xlu1 %v1313_v6, %s1040_s29 }
 0x10f   : > { %754 = vrot.lane.b32.xlu0 %v690_v48, %s1040_s29 }
 0x139   : > { %v733_v38 = vpop.permute.xlu2 %732 }
 0x13a   : > { %776 = vst.msk [vmem:[%s1548_s6 + $0x10] sm:$0xf] %vm1632_vm13, %v733_v38 }
 0x141   : > { %v741_v3 = vpop.permute.xlu2 %740 }
 0x142   : > { %780 = vst.msk [vmem:[%s1548_s6 + $0x20] sm:$0xf] %vm1633_vm14, %v741_v3 }
 0x149   : > { %v735_v20 = vpop.permute.xlu2 %734 }
 0x14a   : > { %777 = vst.msk [vmem:[%s1548_s6 + $0x14] sm:$0xf] %vm1634_vm15, %v735_v20 }
 0x151   : > { %v747_v23 = vpop.permute.xlu2 %746 }
 0x152   : > { %783 = vst.msk [vmem:[%s1548_s6 + $0x2c] sm:$0xf] %vm1626_vm0, %v747_v23 }
 0x159   : > { %v725_v28 = vpop.permute.xlu0 %724  ;;  %v753_v35 = vpop.permute.xlu2 %752 }
 0x15a   : > { %772 = vst.msk [vmem:[%s1548_s6] sm:$0xf] %vm1635_vm1, %v725_v28 }
 0x15b   : > { %786 = vst.msk [vmem:[%s1548_s6 + $0x38] sm:$0xf] %vm1636_vm10, %v753_v35 }
 0x15f   : > { %v729_v6 = vpop.permute.xlu1 %728 }
 0x160   : > { %774 = vst.msk [vmem:[%s1548_s6 + $0x8] sm:$0xf] %vm1637_vm2, %v729_v6 }
 0x161   : > { %v749_v63 = vpop.permute.xlu0 %748 }
 0x162   : > { %784 = vst.msk [vmem:[%s1548_s6 + $0x30] sm:$0xf] %vm1638_vm8, %v749_v63 }
 0x167   : > { %v745_v41 = vpop.permute.xlu1 %744 }
 0x168   : > { %782 = vst.msk [vmem:[%s1548_s6 + $0x28] sm:$0xf] %vm1639_vm4, %v745_v41 }
 0x169   : > { %v727_v24 = vpop.permute.xlu0 %726 }
 0x16a   : > { %773 = vst.msk [vmem:[%s1548_s6 + $0x4] sm:$0xf] %vm1640_vm6, %v727_v24 }
 0x16f   : > { %v731_v43 = vpop.permute.xlu1 %730 }
 0x170   : > { %775 = vst.msk [vmem:[%s1548_s6 + $0xc] sm:$0xf] %vm1641_vm3, %v731_v43 }
 0x171   : > { %v743_v57 = vpop.permute.xlu0 %742 }
 0x172   : > { %781 = vst.msk [vmem:[%s1548_s6 + $0x24] sm:$0xf] %vm1642_vm7, %v743_v57 }
 0x177   : > { %v739_v42 = vpop.permute.xlu1 %738 }
 0x178   : > { %779 = vst.msk [vmem:[%s1548_s6 + $0x1c] sm:$0xf] %vm1643_vm11, %v739_v42 }
 0x179   : > { %v737_v36 = vpop.permute.xlu0 %736 }
 0x17a   : > { %778 = vst.msk [vmem:[%s1548_s6 + $0x18] sm:$0xf] %vm1644_vm5, %v737_v36 }
 0x17f   : > { %v751_v44 = vpop.permute.xlu1 %750 }
 0x180   : > { %785 = vst.msk [vmem:[%s1548_s6 + $0x34] sm:$0xf] %vm1645_vm9, %v751_v44 }
 0x181   : > { %v755_v62 = vpop.permute.xlu0 %754 }
 0x182   : > { %787 = vst.msk [vmem:[%s1548_s6 + $0x3c] sm:$0xf] %vm1646_vm12, %v755_v62 }
 0x183 PF: > { %s15_s15 = sadd.s32 1, %s1038_s15  }
 0x184   : > { %p12_p4 = scmp.ge.s32.totalorder %s15_s15, 6  }
 0x186   :  { %14 = sbr.rel (!%p12_p4) target bundleno = 1 (0x1), region = 74 }

</bundles_post_ra>
